<compile_context>
chip_gen: v6e
topology: v6e:2x2x1
jax: 0.10.0
libtpu: 0.0.40
codegen_flags: <defaults>
</compile_context>

<pallas_src>
import jax
import jax.numpy as jnp
from jax.experimental import pallas as pl
from jax.experimental.pallas import tpu as pltpu


def _residual_pointwise_kernel(x_ref, w_ref, b_ref, o_ref):
    """o = (W @ x + b) + x ; channels on sublanes, spatial (lane-dense) on lanes.

    x_ref/o_ref: (1, C, ts)   w_ref: (C, C)   b_ref: (C, 1)
    """
    C = x_ref.shape[1]
    x = x_ref[0]                                 # (C, ts)
    xf = x.astype(jnp.float32)
    wf = w_ref[...].astype(jnp.float32)          # (C_out, C_in)
    bf = b_ref[...].astype(jnp.float32)          # (C, 1)

    if C <= 32:
        # Tiny contraction: skip the MXU, unrolled VPU FMAs over input channels.
        acc = jnp.broadcast_to(bf, xf.shape)                     # bias, f32
        for ci in range(C):
            acc = acc + wf[:, ci:ci + 1] * xf[ci:ci + 1, :]      # (C,1)*(1,ts)
    else:
        acc = jnp.dot(wf, xf, preferred_element_type=jnp.float32) + bf

    # residual add in f32, single cast on the way out
    o_ref[0] = (acc + xf).astype(o_ref.dtype)


def residual_forward(x_nchw, weight, bias, *, tile_bytes_budget=2 << 20):
    """Residual(Conv2d(C, C, kernel_size=1))(x) with PyTorch NCHW semantics.

    x_nchw : (N, C, H, W)
    weight : (C, C)   -- torch Conv2d weight (C_out, C_in, 1, 1) squeezed
    bias   : (C,)
    """
    N, C, H, W = x_nchw.shape
    HW = H * W
    x3d = x_nchw.reshape(N, C, HW)          # free reshape, NCHW order preserved

    # Lane-dense spatial tile: multiple of 128, sized from a VMEM byte budget.
    LANE = 128
    itemsize = jnp.dtype(x_nchw.dtype).itemsize
    hw_ceil = pl.cdiv(HW, LANE) * LANE
    max_cols = max(LANE, (tile_bytes_budget // (C * itemsize)) // LANE * LANE)
    ts = int(min(hw_ceil, max_cols))
    hw_pad = pl.cdiv(HW, ts) * ts
    if hw_pad != HW:
        x3d = jnp.pad(x3d, ((0, 0), (0, 0), (0, hw_pad - HW)))

    b2d = bias.reshape(C, 1)
    grid = (N, hw_pad // ts)

    out3d = pl.pallas_call(
        _residual_pointwise_kernel,
        out_shape=jax.ShapeDtypeStruct((N, C, hw_pad), x3d.dtype),
        grid_spec=pltpu.PrefetchScalarGridSpec(
            num_scalar_prefetch=0,
            grid=grid,
            in_specs=[
                pl.BlockSpec((1, C, ts), lambda n, s: (n, 0, s)),   # x tile
                pl.BlockSpec((C, C), lambda n, s: (0, 0)),          # weight (resident)
                pl.BlockSpec((C, 1), lambda n, s: (0, 0)),          # bias (resident)
            ],
            out_specs=pl.BlockSpec((1, C, ts), lambda n, s: (n, 0, s)),
        ),
        compiler_params=pltpu.CompilerParams(
            dimension_semantics=("parallel", "parallel"),
            vmem_limit_bytes=32 * 1024 * 1024,   # explicit budget; safe on v5e/v6e/v7x
        ),
    )(x3d, weight, b2d)

    if hw_pad != HW:
        out3d = out3d[:, :, :HW]
    return out3d.reshape(N, C, H, W)


if __name__ == "__main__":
    key = jax.random.PRNGKey(0)
    kx, kw, kb = jax.random.split(key, 3)

    N, C, H, W = 2, 4, 16, 16
    x = jax.random.normal(kx, (N, C, H, W), dtype=jnp.float32)

    # deterministic synthetic parameters for the inner block (1x1 conv C->C)
    weight = jax.random.normal(kw, (C, C), dtype=jnp.float32) * 0.1
    bias = jax.random.normal(kb, (C,), dtype=jnp.float32) * 0.1

    out = jax.block_until_ready(residual_forward(x, weight, bias))

    # pure-JAX reference of Residual semantics: block(x) + x
    ref = jnp.einsum("oc,nchw->nohw", weight, x) + bias.reshape(1, C, 1, 1) + x
    assert out.shape == x.shape and out.dtype == x.dtype
    assert jnp.allclose(out, ref, atol=1e-5, rtol=1e-5)

    print("KERNEL_OK")
</pallas_src>

<mosaic_0001>
module attributes {stable_mosaic.version = 11 : i64} {
  func.func @_residual_pointwise_kernel(%arg0: i32, %arg1: i32, %arg2: memref<1x4x256xf32, #tpu.memory_space<vmem>>, %arg3: memref<4x4xf32, #tpu.memory_space<vmem>>, %arg4: memref<4x1xf32, #tpu.memory_space<vmem>>, %arg5: memref<1x4x256xf32, #tpu.memory_space<vmem>>) attributes {dimension_semantics = [#tpu.dimension_semantics<parallel>, #tpu.dimension_semantics<parallel>], iteration_bounds = array<i64: 2, 1>, scalar_prefetch = 0 : i64, scratch_operands = 0 : i64, tpu.core_type = #tpu.core_type<tc>, window_params = [{transform_indices = @transform_0, window_bounds = array<i64: 1, 4, 256>}, {pipeline_mode = #tpu.pipeline_mode<synchronous>, transform_indices = @transform_1, window_bounds = array<i64: 4, 4>}, {pipeline_mode = #tpu.pipeline_mode<synchronous>, transform_indices = @transform_2, window_bounds = array<i64: 4, 1>}, {transform_indices = @transform_3, window_bounds = array<i64: 1, 4, 256>}]} {
    %c0 = arith.constant 0 : index
    %c0_0 = arith.constant 0 : index
    %c0_1 = arith.constant 0 : index
    %0 = vector.load %arg2[%c0, %c0_0, %c0_1] : memref<1x4x256xf32, #tpu.memory_space<vmem>>, vector<1x4x256xf32>
    %1 = vector.shape_cast %0 : vector<1x4x256xf32> to vector<4x256xf32>
    %c0_2 = arith.constant 0 : index
    %c0_3 = arith.constant 0 : index
    %2 = vector.load %arg3[%c0_2, %c0_3] : memref<4x4xf32, #tpu.memory_space<vmem>>, vector<4x4xf32>
    %c0_4 = arith.constant 0 : index
    %c0_5 = arith.constant 0 : index
    %3 = vector.load %arg4[%c0_4, %c0_5] : memref<4x1xf32, #tpu.memory_space<vmem>>, vector<4x1xf32>
    %4 = vector.shape_cast %3 : vector<4x1xf32> to vector<4x1xf32>
    %5 = vector.broadcast %4 : vector<4x1xf32> to vector<4x256xf32>
    %6 = vector.extract_strided_slice %2 {offsets = [0, 0], sizes = [4, 1], strides = [1, 1]} : vector<4x4xf32> to vector<4x1xf32>
    %7 = vector.extract_strided_slice %1 {offsets = [0, 0], sizes = [1, 256], strides = [1, 1]} : vector<4x256xf32> to vector<1x256xf32>
    %8 = vector.broadcast %6 : vector<4x1xf32> to vector<4x256xf32>
    %9 = vector.broadcast %7 : vector<1x256xf32> to vector<4x256xf32>
    %10 = arith.mulf %8, %9 : vector<4x256xf32>
    %11 = arith.addf %5, %10 : vector<4x256xf32>
    %12 = vector.extract_strided_slice %2 {offsets = [0, 1], sizes = [4, 1], strides = [1, 1]} : vector<4x4xf32> to vector<4x1xf32>
    %13 = vector.extract_strided_slice %1 {offsets = [1, 0], sizes = [1, 256], strides = [1, 1]} : vector<4x256xf32> to vector<1x256xf32>
    %14 = vector.broadcast %12 : vector<4x1xf32> to vector<4x256xf32>
    %15 = vector.broadcast %13 : vector<1x256xf32> to vector<4x256xf32>
    %16 = arith.mulf %14, %15 : vector<4x256xf32>
    %17 = arith.addf %11, %16 : vector<4x256xf32>
    %18 = vector.extract_strided_slice %2 {offsets = [0, 2], sizes = [4, 1], strides = [1, 1]} : vector<4x4xf32> to vector<4x1xf32>
    %19 = vector.extract_strided_slice %1 {offsets = [2, 0], sizes = [1, 256], strides = [1, 1]} : vector<4x256xf32> to vector<1x256xf32>
    %20 = vector.broadcast %18 : vector<4x1xf32> to vector<4x256xf32>
    %21 = vector.broadcast %19 : vector<1x256xf32> to vector<4x256xf32>
    %22 = arith.mulf %20, %21 : vector<4x256xf32>
    %23 = arith.addf %17, %22 : vector<4x256xf32>
    %24 = vector.extract_strided_slice %2 {offsets = [0, 3], sizes = [4, 1], strides = [1, 1]} : vector<4x4xf32> to vector<4x1xf32>
    %25 = vector.extract_strided_slice %1 {offsets = [3, 0], sizes = [1, 256], strides = [1, 1]} : vector<4x256xf32> to vector<1x256xf32>
    %26 = vector.broadcast %24 : vector<4x1xf32> to vector<4x256xf32>
    %27 = vector.broadcast %25 : vector<1x256xf32> to vector<4x256xf32>
    %28 = arith.mulf %26, %27 : vector<4x256xf32>
    %29 = arith.addf %23, %28 : vector<4x256xf32>
    %30 = arith.addf %29, %1 : vector<4x256xf32>
    %c0_6 = arith.constant 0 : index
    %c0_7 = arith.constant 0 : index
    %c0_8 = arith.constant 0 : index
    %31 = vector.load %arg5[%c0_6, %c0_7, %c0_8] : memref<1x4x256xf32, #tpu.memory_space<vmem>>, vector<1x4x256xf32>
    %32 = vector.shape_cast %31 : vector<1x4x256xf32> to vector<4x256xf32>
    %33 = vector.shape_cast %30 : vector<4x256xf32> to vector<1x4x256xf32>
    tpu.vector_store %arg5[%c0_6, %c0_7, %c0_8], %33 {strides = array<i32>} : memref<1x4x256xf32, #tpu.memory_space<vmem>>, vector<1x4x256xf32>,
    return
  }
  func.func @transform_0(%arg0: i32, %arg1: i32) -> (i32, i32, i32) {
    %c0_i32 = arith.constant 0 : i32
    %c0_i32_0 = arith.constant 0 : i32
    return %arg0, %c0_i32, %arg1 : i32, i32, i32
  }
  func.func @transform_1(%arg0: i32, %arg1: i32) -> (i32, i32) {
    %c0_i32 = arith.constant 0 : i32
    %c0_i32_0 = arith.constant 0 : i32
    %c0_i32_1 = arith.constant 0 : i32
    return %c0_i32, %c0_i32_0 : i32, i32
  }
  func.func @transform_2(%arg0: i32, %arg1: i32) -> (i32, i32) {
    %c0_i32 = arith.constant 0 : i32
    %c0_i32_0 = arith.constant 0 : i32
    %c0_i32_1 = arith.constant 0 : i32
    return %c0_i32, %c0_i32_0 : i32, i32
  }
  func.func @transform_3(%arg0: i32, %arg1: i32) -> (i32, i32, i32) {
    %c0_i32 = arith.constant 0 : i32
    %c0_i32_0 = arith.constant 0 : i32
    return %arg0, %c0_i32, %arg1 : i32, i32, i32
  }
}

</mosaic_0001>

<bundles_post_ra>
// kernel: tpu_custom_call.1
= control target key start
LH: loop header
LB: loop body
LE: loop exit
PB: predicated region body
PF: predicated region fallthrough
CT: control target
= control target key end

     0   :  { %8 = vsyncpa [#allocation3], 0  ;;  %s799_s0 = inlined_call_operand.hbm [shape: f32[2,4,256], index: 0, kind: input, shape index: {}]   ;;  %s800_s1 = inlined_call_operand.vmem [shape: f32[4,4], index: 1, kind: input, shape index: {}]   ;;  %s801_s2 = inlined_call_operand.vmem [shape: f32[4,1], index: 2, kind: input, shape index: {}]   ;;  %s802_s3 = inlined_call_operand.hbm [shape: f32[2,4,256], index: 3, kind: output, shape index: {}]  }
   0x1   :  { %10 = vsyncpa [#allocation3 + $0x1], 0 }
   0x2   :  { %11 = vsyncpa [#allocation4], 0 }
   0x3   :  { %13 = vsyncpa [#allocation4 + $0x1], 0  ;;  %s655_s12 = smov 0   ;;  %s657_s13 = smov 0  }
   0x4   :  { %s659_s14 = smov 0   ;;  %s661_s15 = smov 0  }
   0x5   :  { %s663_s16 = smov 0   ;;  %s665_s17 = smov 0  }
   0x6 LB: > { %s431_s18 = sadd.s32 4294967295, %s627_s17   ;;  %s432_s19 = sadd.s32 4294967294, %s627_s17   ;;  %s627_s17 = sphi %s665_s17, %s19_s17   ;;  %s623_s16 = sphi %s663_s16, %s814_s16   ;;  %s619_s15 = sphi %s661_s15, %s813_s15   ;;  %s615_s14 = sphi %s659_s14, %s812_s14   ;;  %s611_s13 = sphi %s657_s13, %s811_s13   ;;  %s607_s12 = sphi %s655_s12, %s810_s12  }
   0x7   : > { %s31_s20 = sadd.s32 1, %s623_s16  ;;  %s40_s21 = sadd.s32 1, %s615_s14 }
   0x8   : > { %p33_p0 = scmp.ge.s32.totalorder %s31_s20, 2  ;;  %p47_p1 = scmp.ne.s32.totalorder %s615_s14, %s611_s13 }
   0x9   : > { %p48_p2 = scmp.eq.s32.totalorder %s627_s17, 0  ;;  %p53_p3 = scmp.ne.s32.totalorder %s611_s13, %s607_s12 }
   0xa   : > { %s816_s20 = smov (%p33_p0, %s31_s20), 0  ;;  %p54_p5 = scmp.eq.s32.totalorder %s431_s18, 0 }
   0xb   : > { %p696_p4 = por %p48_p2, %p47_p1  ;;  %s35_s23 = ssub.s32 %s623_s16, %s816_s20 }
   0xc   : > { %p121_p6 = scmp.eq.s32.totalorder %s431_s18, 1  ;;  %p38_p7 = scmp.eq.s32.totalorder %s35_s23, 0 }
   0xd   : > { %p702_p8 = por %p54_p5, %p53_p3  ;;  %p127_p10 = scmp.eq.s32.totalorder %s432_s19, 1 }
   0xe   : > { %p706_p9 = por %p121_p6, %p47_p1  ;;  %p460_p13 = scmp.lt.s32.totalorder %s627_s17, 2 }
   0xf   : > { %s711_s26 = scalar_select %p38_p7, %s615_s14, %s40_s21  }
  0x10   : > { %p713_p11 = por %p127_p10, %p53_p3  ;;  %s153_s28 = sand.u32 1, %s615_s14  }
  0x11   : > { %s435_s29 = sshll.u32 %s153_s28, 3  ;;  %s446_s30 = sshll.u32 %s623_s16, 7 }
  0x12   : > { %s806_s27 = scalar_select %p713_p11, 1, 0 }
  0x13   : > { %s165_s6 = scalar_lea.hbm %s799_s0, %s446_s30  ;;  %s157_s7 = scalar_lea.vmem [#allocation2], %s435_s29 }
  0x14   : > { %s167_s8 = sshll.u32 %s157_s7, 4  ;;  %p726_p0 = pnand %p460_p13, %p696_p4  ;;  %s168_s8 = int_to_ptr.vmem [resolvable:$true] %s167_s8 }
  0x15   : > { %p438_p1 = scmp.ge.s32.totalorder %s627_s17, 1  ;;  %p172_p2 = scmp.lt.s32.totalorder %s627_s17, 3 }
  0x16   : > { %s154_s10 = scalar_lea.sflag [#allocation3], %s153_s28  ;;  %p521_p3 = pneg %p726_p0 }
  0x17   : > { %s532_s11 = scalar_lea.vmem %s168_s8, 128  ;;  %s629_s18 = smov [#allocation2]  }
  0x18   : > { %p533_p5 = scmp.ne.s32.totalorder %s168_s8, %s532_s11  ;;  %s537_s19 = sshll.u32 %s629_s18, 4  ;;  %s538_s19 = int_to_ptr.vmem [resolvable:$false] %s537_s19 }
  0x19   : > { %s539_s21 = scalar_lea.vmem %s538_s19, 256  ;;  %p540_p10 = scmp.lt.s32.totalorder %s168_s8, %s538_s19 }
  0x1a   : > { %p535_p6 = pnand %p533_p5, %p521_p3  ;;  %p541_p12 = scmp.lt.s32.totalorder %s539_s21, %s532_s11 }
  0x1c   : > { %p536_p7 = pneg %p535_p6  ;;  %p542_p4 = por %p541_p12, %p540_p10 }
  0x1e   : > { %p543_p13 = pnand %p542_p4, %p536_p7 }
  0x20   : > { %546 = shalt.err (!%p543_p13)
}
  0x21   : > { %455 = dma.hbm_to_vmem [thread:$0]  (!%p726_p0), %s165_s6, 128, %s168_s8, %s154_s10  }
  0x22   : > { %p173_p11 = pnand %p438_p1, %p172_p2 }
  0x23   : > { %s741_s22 = sand.u32 (!%p173_p11), 1, %s611_s13  }
  0x24   : > { %176 = sbr.rel (%p173_p11) target bundleno = 198 (0xc6), region = 32  ;;  %s439_s23 = sshll.u32 (!%p173_p11), %s741_s22, 3 }
  0x25   : > { %s179_s28 = scalar_lea.sflag (!%p173_p11), [#allocation3], %s741_s22  ;;  %s182_s29 = scalar_lea.vmem (!%p173_p11), [#allocation2], %s439_s23 }
  0x29   : > { %598 = dma.done.wait (%p702_p8), %s179_s28, 128  }
  0x2a   : > { %600 = vsyncadd (%p702_p8), %s179_s28, 4294967168  ;;  %v630_v0 = vmov 0   ;;  %v631_v1 = vmov 1   ;;  %v208_v2 = vld [vmem:[%s800_s1] sm:$0xf]  ;;  %v632_v4 = vmov 2   ;;  %v221_v6 = vlaneseq }
  0x2b   : > { %514 = vset.pattern.permute.xlu0 %v630_v0  ;;  %515 = vset.pattern.permute.xlu1 %v631_v1  ;;  %v209_v3 = vld [vmem:[%s801_s2] sm:$0xf]  ;;  %v633_v5 = vmov 3   ;;  %s447_s24 = sshll.u32 %s619_s15, 7  ;;  %s204_s7 = scalar_lea.vmem [#allocation5], %s439_s23 }
  0x2c   : > { %217 = vperm.xlu0 %514, %v208_v2   ;;  %244 = vperm.xlu1 %515, %v208_v2   ;;  %v222_v7 = vshrl.u32 %v221_v6, 7  ;;  %v207_v10 = vld [vmem:[%s182_s29] sm:$0xff]  ;;  %s347_s8 = sshll.u32 %s204_s7, 4  ;;  %s345_s11 = scalar_lea.hbm %s802_s3, %s447_s24  ;;  %s348_s8 = int_to_ptr.vmem [resolvable:$true] %s347_s8 }
  0x2d   : > { %v321_v52 = vcombine.high %v207_v10, %v207_v10  ;;  %s331_s18 = scalar_lea.sflag [#allocation4], %s741_s22  ;;  %s547_s19 = scalar_lea.vmem %s348_s8, 128 }
  0x2e   : > { %v223_v8 = vsub.s32 0, %v222_v7  ;;  %v227_v9 = vsub.s32 4, %v222_v7  ;;  %v249_v11 = vsub.s32 1, %v222_v7  ;;  %v253_v12 = vsub.s32 5, %v222_v7  ;;  %p548_p8 = scmp.ne.s32.totalorder %s348_s8, %s547_s19  ;;  %s634_s21 = smov [#allocation5]  }
  0x2f   : > { %v275_v13 = vsub.s32 2, %v222_v7  ;;  %v279_v14 = vsub.s32 6, %v222_v7  ;;  %v301_v21 = vsub.s32 3, %v222_v7  ;;  %v305_v22 = vsub.s32 7, %v222_v7  ;;  %s551_s15 = sshll.u32 %s634_s21, 4  ;;  %s552_s15 = int_to_ptr.vmem [resolvable:$false] %s551_s15 }
  0x30   : > { %212 = vperm.xlu0 %514, %v209_v3   ;;  %516 = vset.pattern.permute.xlu1 %v632_v4  ;;  %v224_v15 = vrot.slane %v207_v10, %v223_v8  ;;  %v228_v16 = vrot.slane %v207_v10, %v227_v9  ;;  %v250_v17 = vrot.slane %v207_v10, %v249_v11  ;;  %p549_p11 = pnand %p548_p8, %p706_p9  ;;  %s553_s23 = scalar_lea.vmem %s552_s15, 256 }
  0x31   : > { %270 = vperm.xlu1 %516, %v208_v2   ;;  %v254_v18 = vrot.slane %v207_v10, %v253_v12  ;;  %v276_v19 = vrot.slane %v207_v10, %v275_v13  ;;  %v280_v20 = vrot.slane %v207_v10, %v279_v14  ;;  %v302_v31 = vrot.slane %v207_v10, %v301_v21  ;;  %p554_p0 = scmp.lt.s32.totalorder %s348_s8, %s552_s15  ;;  %p555_p1 = scmp.lt.s32.totalorder %s553_s23, %s547_s19 }
  0x32   : > { %v234_v23 = vrot.slane %v224_v15, %v223_v8  ;;  %v238_v24 = vrot.slane %v228_v16, %v223_v8  ;;  %v260_v27 = vrot.slane %v250_v17, %v249_v11  ;;  %v306_v32 = vrot.slane %v207_v10, %v305_v22  ;;  %p550_p12 = pneg %p549_p11 }
  0x33   : > { %v264_v28 = vrot.slane %v254_v18, %v249_v11  ;;  %v286_v29 = vrot.slane %v276_v19, %v275_v13  ;;  %v290_v30 = vrot.slane %v280_v20, %v275_v13  ;;  %v312_v43 = vrot.slane %v302_v31, %v301_v21  ;;  %p556_p2 = por %p555_p1, %p554_p0 }
  0x34   : > { %517 = vset.pattern.permute.xlu0 %v633_v5  ;;  %v316_v44 = vrot.slane %v306_v32, %v301_v21 }
  0x35   : > { %296 = vperm.xlu0 %517, %v208_v2   ;;  %p557_p3 = pnand %p556_p2, %p550_p12 }
  0xa7   : > { %v218_v25 = vpop.permute.xlu0 %217  ;;  %v245_v26 = vpop.permute.xlu1 %244 }
  0xa8   : > { %v239_v33 = vmul.f32 %v234_v23, %v218_v25  ;;  %v240_v34 = vmul.f32 %v238_v24, %v218_v25  ;;  %v265_v36 = vmul.f32 %v260_v27, %v245_v26  ;;  %v266_v37 = vmul.f32 %v264_v28, %v245_v26 }
  0xab   : > { %v213_v35 = vpop.permute.xlu0 %212 }
  0xac   : > { %v241_v38 = vadd.f32 %v239_v33, %v213_v35  ;;  %v242_v39 = vadd.f32 %v240_v34, %v213_v35  ;;  %v271_v40 = vpop.permute.xlu1 %270 }
  0xad   : > { %v291_v41 = vmul.f32 %v286_v29, %v271_v40  ;;  %v292_v42 = vmul.f32 %v290_v30, %v271_v40 }
  0xae   : > { %v267_v45 = vadd.f32 %v265_v36, %v241_v38  ;;  %v268_v46 = vadd.f32 %v266_v37, %v242_v39 }
  0xb0   : > { %v293_v47 = vadd.f32 %v291_v41, %v267_v45  ;;  %v294_v48 = vadd.f32 %v292_v42, %v268_v46  ;;  %v297_v49 = vpop.permute.xlu0 %296 }
  0xb1   : > { %v317_v50 = vmul.f32 %v312_v43, %v297_v49  ;;  %v318_v51 = vmul.f32 %v316_v44, %v297_v49 }
  0xb3   : > { %v319_v53 = vadd.f32 %v317_v50, %v293_v47  ;;  %v320_v54 = vadd.f32 %v318_v51, %v294_v48 }
  0xb5   : > { %v323_v55 = vadd.f32 %v319_v53, %v207_v10  ;;  %v324_v56 = vadd.f32 %v321_v52, %v320_v54 }
  0xb7   : > { %v327_v57 = vcombine.low %v323_v55, %v324_v56 }
  0xb9   : > { %329 = vst [vmem:[%s204_s7] sm:$0xff] %v327_v57 }
  0xba   : > { %560 = shalt.err (!%p557_p3)
}
  0xbb   : > { %s561_s28 = scalar_lea.hbm %s345_s11, 128  ;;  %s565_s30 = scalar_lea.hbm %s802_s3, 256 }
  0xbc   : > { %p562_p5 = scmp.ne.s32.totalorder %s345_s11, %s561_s28  ;;  %p566_p10 = scmp.lt.s32.totalorder %s345_s11, %s802_s3 }
  0xbd   : > { %p567_p4 = scmp.lt.s32.totalorder %s565_s30, %s561_s28 }
  0xbe   : > { %p563_p6 = pnand %p562_p5, %p706_p9 }
  0xbf   : > { %p568_p13 = por %p567_p4, %p566_p10 }
  0xc0   : > { %p564_p7 = pneg %p563_p6 }
  0xc2   : > { %p569_p8 = pnand %p568_p13, %p564_p7 }
  0xc4   : > { %572 = shalt.err (!%p569_p8)
}
  0xc5   : > { %450 = dma.vmem_to_hbm [thread:$0]  (%p706_p9), %s348_s8, 128, %s345_s11, %s331_s18  }
  0xc6 PF: > { %s359_s6 = sand.u32 1, %s607_s12   ;;  %p808_p11 = scmp.ne.s32.totalorder %s806_s27, 0 }
  0xc7   : > { %p809_p12 = scmp.ge.s32.totalorder %s627_s17, 2  ;;  %s360_s24 = scalar_lea.sflag [#allocation4], %s359_s6 }
  0xc9   : > { %p457_p0 = pnand %p809_p12, %p808_p11 }
  0xcb   : > { %p458_p1 = pneg %p457_p0 }
  0xcd   : > { %602 = dma.done.wait (%p458_p1), %s360_s24, 128  }
  0xce   : > { %604 = vsyncadd (%p458_p1), %s360_s24, 4294967168  ;;  %s19_s17 = sadd.s32 1, %s627_s17   ;;  %s810_s12 = smov %s611_s13 }
  0xcf   : > { %p16_p2 = scmp.ge.s32.totalorder %s19_s17, 4   ;;  %s811_s13 = smov %s615_s14 }
  0xd0   : > { %s812_s14 = smov %s711_s26  ;;  %s813_s15 = smov %s623_s16 }
  0xd1   : > { %s814_s16 = smov %s816_s20  ;;  %18 = sbr.rel (!%p16_p2) target bundleno = 6 (0x6), region = 77 }
  0xd6   :  { %365 = vsyncpa [#allocation3], 1 }
  0xd7   :  { %367 = vsyncpa [#allocation3 + $0x1], 1 }
  0xd8   :  { %368 = vsyncpa [#allocation4], 1 }
  0xd9   :  { %370 = vsyncpa [#allocation4 + $0x1], 1 }

</bundles_post_ra>
